<compile_context>
chip_gen: v5e
topology: v5e:2x2
jax: 0.10.0
libtpu: 0.0.40
codegen_flags: <defaults>
</compile_context>

<pallas_src>
import functools

import jax
import jax.numpy as jnp
from jax.experimental import pallas as pl
from jax.experimental.pallas import tpu as pltpu


# ---------------------------------------------------------------------------
# Kernels
# ---------------------------------------------------------------------------
def _l1_mean_single_kernel(x_ref, out_ref, *, label_val, inv_n):
    """Whole (small) array in one block: out = mean(|x - label|)."""
    x = x_ref[...].astype(jnp.float32)
    out_ref[...] = jnp.sum(jnp.abs(x - label_val), keepdims=True) * inv_n


def _l1_partial_sum_kernel(x_ref, out_ref, acc_ref, *, label_val, n_rows,
                           tile_rows, steps_per_part, last_blk, needs_mask):
    """Per-partition partial sums of |x - label| into an (8, 128) accumulator."""
    p = pl.program_id(0)   # partition axis ("parallel")
    k = pl.program_id(1)   # reduction step within the partition ("arbitrary")

    @pl.when(k == 0)
    def _():
        acc_ref[...] = jnp.zeros_like(acc_ref)

    x = x_ref[...].astype(jnp.float32)            # (tile_rows, cols)
    diff = jnp.abs(x - label_val)
    cols = diff.shape[1]
    blk = p * steps_per_part + k                  # un-clamped block index

    def _accumulate(d):
        # Fold the sublane-major axis with plain vector adds (VALU); the
        # cross-lane reduce happens once, wrapper side.
        acc_ref[...] += jnp.sum(d.reshape(tile_rows // 8, 8, cols), axis=0)

    if needs_mask:
        # Interior blocks: no mask work at all.
        @pl.when(blk < last_blk)
        def _():
            _accumulate(diff)

        # Last logical block (possibly ragged) and clamped overhang blocks:
        # zero out rows past the logical end.  Predicate built from a
        # (tile_rows, 1) column so the select broadcasts across lanes.
        @pl.when(blk >= last_blk)
        def _():
            row_ids = blk * tile_rows + jax.lax.broadcasted_iota(
                jnp.int32, (tile_rows, 1), 0)
            _accumulate(jnp.where(row_ids < n_rows, diff, 0.0))
    else:
        _accumulate(diff)

    @pl.when(k == steps_per_part - 1)
    def _():
        out_ref[...] = acc_ref[...]


# ---------------------------------------------------------------------------
# Module wrapper
# ---------------------------------------------------------------------------
class GANLoss:
    """JAX/Pallas port of kernelgan.GANLoss.

    The PyTorch module holds constant label maps of shape
    [batch_size, 1, d_last_layer_size, d_last_layer_size] (ones for "real",
    zeros for "fake") and returns L1Loss(reduction='mean') between the
    discriminator map and the (possibly batch-sliced) label map.
    """

    _DEFAULT_BLOCK_BYTES = 4 * 1024 * 1024   # ~4 MiB/block: amortizes per-step
                                             # overhead, 2x fits v5e's 16 MiB
                                             # default scoped VMEM.
    _VMEM_LIMIT_BYTES = 32 * 1024 * 1024     # explicit, portable v5e/v6e/v7x
    _NUM_PARTITIONS = 2                      # v7x has 2 TCs; harmless elsewhere
    _LANES = 128

    def __init__(self, d_last_layer_size, batch_size=1, device=None,
                 max_block_bytes=None):
        del device  # parity with the PyTorch signature; unused on TPU
        self.label_shape = (batch_size, 1, d_last_layer_size, d_last_layer_size)
        # Buffers of the original module (kept for parity; never materialized
        # inside the kernel — the label is a compile-time constant).
        self.label_tensor_fake = jnp.zeros(self.label_shape, jnp.float32)
        self.label_tensor_real = jnp.ones(self.label_shape, jnp.float32)
        self.max_block_bytes = (max_block_bytes if max_block_bytes is not None
                                else self._DEFAULT_BLOCK_BYTES)

    def __call__(self, d_last_layer, is_d_input_real):
        label_val = 1.0 if is_d_input_real else 0.0

        x = jnp.asarray(d_last_layer)
        if x.dtype.name not in ("float32", "bfloat16"):
            x = x.astype(jnp.float32)

        # PyTorch branch: if d's batch is smaller than the stored label's, the
        # label is sliced to match.  Because the label map is constant, both
        # branches reduce to mean(|d - label_val|) over d's own elements.
        n_elem = int(x.size)
        inv_n = 1.0 / n_elem
        cols = self._LANES

        # Lane-dense layout: flat-pad with label_val (contributes 0 to the L1
        # sum) so the last dim is always a full 128 lanes.
        flat = x.reshape(-1)
        pad = (-n_elem) % cols
        if pad:
            flat = jnp.concatenate(
                [flat, jnp.full((pad,), label_val, flat.dtype)])
        x2d = flat.reshape(-1, cols)
        n_rows = x2d.shape[0]
        itemsize = x2d.dtype.itemsize

        # Byte-sized tiles (~4 MiB): 8192 rows f32 / 16384 rows bf16.
        tile_rows = self.max_block_bytes // (cols * itemsize)
        tile_rows = max(16, (tile_rows // 16) * 16)

        if n_rows <= tile_rows:
            # Small map: one block, one step, no accumulator / grid overhead.
            out = pl.pallas_call(
                functools.partial(_l1_mean_single_kernel,
                                  label_val=label_val, inv_n=inv_n),
                out_shape=jax.ShapeDtypeStruct((1, 1), jnp.float32),
                grid=(1,),
                in_specs=[pl.BlockSpec((n_rows, cols), lambda i: (0, 0))],
                out_specs=pl.BlockSpec((1, 1), lambda i: (0, 0)),
                compiler_params=pltpu.CompilerParams(
                    dimension_semantics=("arbitrary",)),
            )(x2d)
            return out[0, 0]

        # Large map: P-way parallel partitions, each a sequential reduction.
        total_blocks = -(-n_rows // tile_rows)
        num_parts = min(self._NUM_PARTITIONS, total_blocks)
        steps_per_part = -(-total_blocks // num_parts)
        ragged = (n_rows % tile_rows) != 0
        overhang = num_parts * steps_per_part > total_blocks
        needs_mask = ragged or overhang

        def x_index(p, k):
            # Clamp overhang steps of the last partition back in-bounds; their
            # contribution is zeroed by the row mask inside the kernel.
            return (jnp.minimum(p * steps_per_part + k, total_blocks - 1), 0)

        # TODO(synk): on v7x, verify the leading "parallel" axis actually shards
        # across both TensorCores; if not, switch it to pltpu.CORE_PARALLEL.
        partial_sums = pl.pallas_call(
            functools.partial(_l1_partial_sum_kernel,
                              label_val=label_val, n_rows=n_rows,
                              tile_rows=tile_rows,
                              steps_per_part=steps_per_part,
                              last_blk=total_blocks - 1,
                              needs_mask=needs_mask),
            out_shape=jax.ShapeDtypeStruct((num_parts * 8, cols), jnp.float32),
            grid=(num_parts, steps_per_part),
            in_specs=[pl.BlockSpec((tile_rows, cols), x_index)],
            out_specs=pl.BlockSpec((8, cols), lambda p, k: (p, 0)),
            scratch_shapes=[pltpu.VMEM((8, cols), jnp.float32)],
            compiler_params=pltpu.CompilerParams(
                dimension_semantics=("parallel", "arbitrary"),
                vmem_limit_bytes=self._VMEM_LIMIT_BYTES),
            cost_estimate=pl.CostEstimate(
                flops=2 * n_rows * cols,
                transcendentals=0,
                bytes_accessed=n_rows * cols * itemsize
                               + num_parts * 8 * cols * 4),
        )(x2d)
        return jnp.sum(partial_sums) * inv_n


# ---------------------------------------------------------------------------
# Reference + self-test
# ---------------------------------------------------------------------------
def _ref_loss(d_last_layer, is_d_input_real):
    x = jnp.asarray(d_last_layer).astype(jnp.float32)
    label = 1.0 if is_d_input_real else 0.0
    return jnp.mean(jnp.abs(x - label))


def _check(loss_mod, x, real, rtol, atol):
    got = jax.block_until_ready(loss_mod(x, real))
    want = jax.block_until_ready(_ref_loss(x, real))
    if not jnp.allclose(got, want, rtol=rtol, atol=atol):
        print("MISMATCH", tuple(x.shape), str(x.dtype), real,
              float(got), float(want))
        return False
    return True


if __name__ == "__main__":
    key = jax.random.PRNGKey(0)
    k1, k2, k3, k4 = jax.random.split(key, 4)
    ok = True

    # 1) Small D map -> single-block path.  NCHW = [2, 1, 16, 16].
    loss_small = GANLoss(d_last_layer_size=16, batch_size=2)
    d_small = jax.random.uniform(k1, (2, 1, 16, 16), jnp.float32)
    ok &= _check(loss_small, d_small, True, 1e-6, 1e-6)
    ok &= _check(loss_small, d_small, False, 1e-6, 1e-6)
    # Batch-slicing branch of the original module (d batch < label batch).
    ok &= _check(loss_small, d_small[:1], True, 1e-6, 1e-6)

    # 2) numel not a multiple of 128 -> label-padded lane-dense path.
    loss_odd = GANLoss(d_last_layer_size=9, batch_size=1)
    d_odd = jax.random.uniform(k2, (1, 1, 9, 9), jnp.float32)
    ok &= _check(loss_odd, d_odd, True, 1e-6, 1e-6)
    ok &= _check(loss_odd, d_odd, False, 1e-6, 1e-6)

    # 3) Tiled path (f32) with ragged tail: the block-byte cap is shrunk so a
    #    small test input exercises the multi-block / 2-partition code path.
    loss_tiled = GANLoss(d_last_layer_size=96, batch_size=2,
                         max_block_bytes=64 * 1024)
    d_tiled = jax.random.uniform(k3, (2, 1, 96, 96), jnp.float32)
    ok &= _check(loss_tiled, d_tiled, False, 1e-5, 1e-6)

    # 4) Tiled path (bf16) with ragged tail AND a clamped overhang grid step.
    loss_bf16 = GANLoss(d_last_layer_size=112, batch_size=3,
                        max_block_bytes=32 * 1024)
    d_bf16 = jax.random.uniform(
        k4, (3, 1, 112, 112), jnp.float32).astype(jnp.bfloat16)
    ok &= _check(loss_bf16, d_bf16, True, 1e-5, 1e-6)

    if ok:
        print("KERNEL_OK")
</pallas_src>

<mosaic_0001>
module attributes {stable_mosaic.version = 11 : i64} {
  func.func @_l1_mean_single_kernel(%arg0: i32, %arg1: memref<4x128xf32, #tpu.memory_space<vmem>>, %arg2: memref<1x1xf32, #tpu.memory_space<vmem>>) attributes {dimension_semantics = [#tpu.dimension_semantics<arbitrary>], iteration_bounds = array<i64: 1>, scalar_prefetch = 0 : i64, scratch_operands = 0 : i64, tpu.core_type = #tpu.core_type<tc>, window_params = [{pipeline_mode = #tpu.pipeline_mode<synchronous>, transform_indices = @transform_0, window_bounds = array<i64: 4, 128>}, {pipeline_mode = #tpu.pipeline_mode<synchronous>, transform_indices = @transform_1, window_bounds = array<i64: 1, 1>}]} {
    %c0 = arith.constant 0 : index
    %c0_0 = arith.constant 0 : index
    %0 = vector.load %arg1[%c0, %c0_0] : memref<4x128xf32, #tpu.memory_space<vmem>>, vector<4x128xf32>
    %cst = arith.constant 1.000000e+00 : f32
    %1 = vector.broadcast %cst : f32 to vector<4x128xf32>
    %2 = arith.subf %0, %1 : vector<4x128xf32>
    %3 = math.absf %2 : vector<4x128xf32>
    %4 = vector.shape_cast %3 : vector<4x128xf32> to vector<1x4x128xf32>
    %cst_1 = arith.constant dense<0.000000e+00> : vector<1xf32>
    %5 = vector.multi_reduction <add>, %4, %cst_1 [1, 2] : vector<1x4x128xf32> to vector<1xf32>
    %6 = vector.shape_cast %5 : vector<1xf32> to vector<1x1x1xf32>
    %7 = vector.extract %6[0, 0, 0] : f32 from vector<1x1x1xf32>
    %8 = vector.broadcast %7 : f32 to vector<1x1xf32>
    %cst_2 = arith.constant 0.001953125 : f32
    %9 = vector.broadcast %cst_2 : f32 to vector<1x1xf32>
    %10 = arith.mulf %8, %9 : vector<1x1xf32>
    %c0_3 = arith.constant 0 : index
    %c0_4 = arith.constant 0 : index
    %11 = vector.load %arg2[%c0_3, %c0_4] : memref<1x1xf32, #tpu.memory_space<vmem>>, vector<1x1xf32>
    tpu.vector_store %arg2[%c0_3, %c0_4], %10 {strides = array<i32>} : memref<1x1xf32, #tpu.memory_space<vmem>>, vector<1x1xf32>,
    return
  }
  func.func @transform_0(%arg0: i32) -> (i32, i32) {
    %c0_i32 = arith.constant 0 : i32
    %c0_i32_0 = arith.constant 0 : i32
    %c0_i32_1 = arith.constant 0 : i32
    return %c0_i32, %c0_i32_0 : i32, i32
  }
  func.func @transform_1(%arg0: i32) -> (i32, i32) {
    %c0_i32 = arith.constant 0 : i32
    %c0_i32_0 = arith.constant 0 : i32
    %c0_i32_1 = arith.constant 0 : i32
    return %c0_i32, %c0_i32_0 : i32, i32
  }
}

</mosaic_0001>

<bundles_post_ra>
// kernel: tpu_custom_call.1
= control target key start
LH: loop header
LB: loop body
LE: loop exit
PB: predicated region body
PF: predicated region fallthrough
CT: control target
= control target key end

     0   :  { %6 = vsyncpa [#allocation3], 0  ;;  %s133_s0 = inlined_call_operand.hbm [shape: f32[4,128], index: 0, kind: input, shape index: {}]   ;;  %s134_s1 = inlined_call_operand.hbm [shape: f32[1,1], index: 1, kind: output, shape index: {}]  }
   0x1   :  { %7 = vsyncpa [#allocation4], 0  ;;  %s13_s8 = sshll.u32 %s133_s0, 4  ;;  %s115_s9 = smov [#allocation2]   ;;  %s14_s8 = int_to_ptr.hbm [resolvable:$true] %s13_s8 }
   0x2   :  { %s15_s10 = sshll.u32 %s115_s9, 4  ;;  %s16_s10 = int_to_ptr.vmem [resolvable:$true] %s15_s10 }
   0x3   :  { %18 = dma.hbm_to_vmem [thread:$0]  %s14_s8, 64, %s16_s10, [#allocation3]  }
   0x4   :  { %111 = dma.done.wait [#allocation3], 64  }
   0x5   :  { %112 = vsyncadd [#allocation3], 4294967232  ;;  %v23_v0 = vld [vmem:[#allocation2] sm:$0xf]  ;;  %vm26_vm0 = vcmask 1043456   ;;  %s116_s0 = smov [#allocation5]  }
   0x6   :  { %v58_v1 = vadd.f32 -1.0, %v23_v0  ;;  %s46_s11 = sshll.u32 %s116_s0, 4  ;;  %s48_s14 = sshll.u32 %s134_s1, 4  ;;  %vm39_vm1 = vcmask 0   ;;  %s47_s11 = int_to_ptr.vmem [resolvable:$true] %s46_s11  ;;  %s49_s14 = int_to_ptr.hbm [resolvable:$true] %s48_s14 }
   0x8   :  { %v25_v2 = vand.u32 2147483647, %v58_v1 }
   0xa   :  { %v27_v3 = vsel %vm26_vm0, %v25_v2, 0.0 }
   0xb   :  { %28 = vadd.xlane.f32.xlu0 %v27_v3 }
  0x7e   :  { %v29_v4 = vpop.xlane.xlu0 %28 }
  0x7f   :  { %v30_v5 = vrot.slane %v29_v4, 4 }
  0x81   :  { %v31_v6 = vadd.f32 %v30_v5, %v29_v4 }
  0x83   :  { %v32_v7 = vrot.slane %v31_v6, 2 }
  0x85   :  { %v33_v8 = vadd.f32 %v32_v7, %v31_v6 }
  0x87   :  { %v34_v9 = vrot.slane %v33_v8, 1 }
  0x89   :  { %v35_v10 = vadd.f32 %v34_v9, %v33_v8 }
  0x8b   :  { %59 = vpush %v35_v10 }
  0xbc   :  { %s60_s15 = spop %59 }
  0xbd   :  { %v37_v11 = vstv %s60_s15 }
  0xbe   :  { %v38_v12 = vmul.f32 0.001953125, %v37_v11 }
  0xc0   :  { %40 = vst.msk [vmem:[#allocation5] sm:$0x1] %vm39_vm1, %v38_v12 }
  0xc1   :  { %51 = dma.vmem_to_hbm [thread:$0]  %s47_s11, 16, %s49_s14, [#allocation4]  }
  0xc2   :  { %113 = dma.done.wait [#allocation4], 16  }
  0xc3   :  { %114 = vsyncadd [#allocation4], 4294967280 }
  0xc4   :  { %56 = vsyncpa [#allocation3], 1 }
  0xc5   :  { %57 = vsyncpa [#allocation4], 1 }

</bundles_post_ra>
